<compile_context>
chip_gen: v6e
topology: v6e:2x2x1
jax: 0.10.0
libtpu: 0.0.40
codegen_flags: <defaults>
</compile_context>

<pallas_src>
import jax
import jax.numpy as jnp
from jax.experimental import pallas as pl
from jax.experimental.pallas import tpu as pltpu


def _round_up(x, m):
    return ((x + m - 1) // m) * m


def mlp_tanh_kernel(x_ref, w1_ref, b1_ref, w2_ref, b2_ref, w3_ref, b3_ref, o_ref):
    # One batch tile per grid step; weights/biases are VMEM-resident across steps.
    # Matmuls: bf16 operands, f32 accumulation on the MXU.
    x = x_ref[...].astype(jnp.bfloat16)
    z1 = jnp.dot(x, w1_ref[...], preferred_element_type=jnp.float32) + b1_ref[...]
    h1 = jnp.tanh(z1.astype(jnp.bfloat16))          # bf16 tanh (feeds bf16 matmul)
    z2 = jnp.dot(h1, w2_ref[...], preferred_element_type=jnp.float32) + b2_ref[...]
    h2 = jnp.tanh(z2.astype(jnp.bfloat16))          # bf16 tanh (feeds bf16 matmul)
    z3 = jnp.dot(h2, w3_ref[...], preferred_element_type=jnp.float32) + b3_ref[...]
    o_ref[...] = jnp.tanh(z3).astype(o_ref.dtype)   # final tanh in f32


def prepare_params(params):
    """One-time parameter preparation (hoisted out of the per-call hot path):
    pad the last layer to a lane-dense multiple of 128 output columns and
    pre-cast all weights to bf16 (biases stay f32: they add to the f32 acc)."""
    w1, b1, w2, b2, w3, b3 = params
    out_dim = w3.shape[1]
    out_pad = _round_up(max(out_dim, 128), 128)
    if out_pad != out_dim:
        w3 = jnp.zeros((w3.shape[0], out_pad), w3.dtype).at[:, :out_dim].set(w3)
        b3 = jnp.zeros((1, out_pad), b3.dtype).at[:, :out_dim].set(b3)
    prepped = (
        w1.astype(jnp.bfloat16), b1.astype(jnp.float32),
        w2.astype(jnp.bfloat16), b2.astype(jnp.float32),
        w3.astype(jnp.bfloat16), b3.astype(jnp.float32),
    )
    return prepped, out_dim, out_pad


def network_forward(x, prepped, out_dim, tile_b=512):
    """Actor MLP forward pass as a batch-tiled Pallas kernel."""
    w1, b1, w2, b2, w3, b3 = prepped
    B, in_dim = x.shape
    h1_dim = w1.shape[1]
    h2_dim = w2.shape[1]
    out_pad = w3.shape[1]

    # --- Batch tiling: balanced tiles, 8-sublane aligned, >=2 steps for v7x. ---
    n_steps = pl.cdiv(B, tile_b)
    if B >= 16:
        n_steps = max(n_steps, 2)          # keep both v7x TensorCores busy
    tb = _round_up(pl.cdiv(B, n_steps), 8)  # balanced last tile (minimal zero rows)
    B_pad = _round_up(B, tb)
    xp = x if B_pad == B else jnp.zeros((B_pad, in_dim), x.dtype).at[:B].set(x)
    grid = (B_pad // tb,)

    def resident(arr):
        # Full-array block with a constant index_map -> DMA'd once, stays in VMEM.
        return pl.BlockSpec(arr.shape, lambda i: (0, 0))

    cost = pl.CostEstimate(
        flops=2 * B_pad * (in_dim * h1_dim + h1_dim * h2_dim + h2_dim * out_pad),
        transcendentals=B_pad * (h1_dim + h2_dim + out_pad),
        bytes_accessed=(
            xp.size * 4 + B_pad * out_pad * 4
            + (w1.size + w2.size + w3.size) * 2
            + (b1.size + b2.size + b3.size) * 4
        ),
    )

    out = pl.pallas_call(
        mlp_tanh_kernel,
        out_shape=jax.ShapeDtypeStruct((B_pad, out_pad), jnp.float32),
        grid=grid,
        in_specs=[
            pl.BlockSpec((tb, in_dim), lambda i: (i, 0)),
            resident(w1), resident(b1),
            resident(w2), resident(b2),
            resident(w3), resident(b3),
        ],
        out_specs=pl.BlockSpec((tb, out_pad), lambda i: (i, 0)),
        compiler_params=pltpu.CompilerParams(
            dimension_semantics=("parallel",),
        ),
        cost_estimate=cost,
    )(xp, w1, b1, w2, b2, w3, b3)

    return out[:B, :out_dim]


def init_params(key, in_dim, out_dim):
    """Deterministic PyTorch-style init: U(-1/sqrt(fan_in), 1/sqrt(fan_in))."""
    dims = [(in_dim, 256), (256, 512), (512, out_dim)]
    params = []
    for (fan_in, fan_out) in dims:
        key, kw, kb = jax.random.split(key, 3)
        bound = 1.0 / (fan_in ** 0.5)
        w = jax.random.uniform(kw, (fan_in, fan_out), jnp.float32, -bound, bound)
        b = jax.random.uniform(kb, (1, fan_out), jnp.float32, -bound, bound)
        params.extend([w, b])
    return tuple(params)


def reference_forward(x, params):
    w1, b1, w2, b2, w3, b3 = params
    h1 = jnp.tanh(x @ w1 + b1)
    h2 = jnp.tanh(h1 @ w2 + b2)
    return jnp.tanh(h2 @ w3 + b3)


if __name__ == "__main__":
    key = jax.random.PRNGKey(0)
    in_dim, out_dim = 32, 8

    kx1, kx2, kp = jax.random.split(key, 3)
    params = init_params(kp, in_dim, out_dim)

    # log_std parameter of the module (unused in forward, kept for parity):
    log_std = jnp.ones((out_dim,), jnp.float32) * -2.5  # noqa: F841

    # One-time param prep (lane padding + bf16 cast) outside the hot path.
    prepped, od, out_pad = prepare_params(params)

    # Small batch: single grid step, no padding waste.
    x_small = jax.random.normal(kx1, (8, in_dim), jnp.float32)
    out_small = jax.block_until_ready(network_forward(x_small, prepped, od))
    ref_small = reference_forward(x_small, params)
    assert out_small.shape == (8, out_dim)
    # bf16 matmul operands / bf16 hidden tanh => relaxed tolerance vs f32 reference.
    assert jnp.allclose(out_small, ref_small, atol=5e-2, rtol=5e-2), "mismatch (B=8)"

    # Larger, non-multiple batch: exercises balanced tiling (2 x 136), padding, slicing.
    x_big = jax.random.normal(kx2, (260, in_dim), jnp.float32)
    out_big = jax.block_until_ready(network_forward(x_big, prepped, od))
    ref_big = reference_forward(x_big, params)
    assert out_big.shape == (260, out_dim)
    assert jnp.allclose(out_big, ref_big, atol=5e-2, rtol=5e-2), "mismatch (B=260)"

    print("KERNEL_OK")
</pallas_src>

<mosaic_0001>
module attributes {stable_mosaic.version = 11 : i64} {
  func.func @mlp_tanh_kernel(%arg0: i32, %arg1: memref<8x32xf32, #tpu.memory_space<vmem>>, %arg2: memref<32x256xbf16, #tpu.memory_space<vmem>>, %arg3: memref<1x256xf32, #tpu.memory_space<vmem>>, %arg4: memref<256x512xbf16, #tpu.memory_space<vmem>>, %arg5: memref<1x512xf32, #tpu.memory_space<vmem>>, %arg6: memref<512x128xbf16, #tpu.memory_space<vmem>>, %arg7: memref<1x128xf32, #tpu.memory_space<vmem>>, %arg8: memref<8x128xf32, #tpu.memory_space<vmem>>) attributes {dimension_semantics = [#tpu.dimension_semantics<parallel>], iteration_bounds = array<i64: 1>, scalar_prefetch = 0 : i64, scratch_operands = 0 : i64, tpu.core_type = #tpu.core_type<tc>, window_params = [{transform_indices = @transform_0, window_bounds = array<i64: 8, 32>}, {pipeline_mode = #tpu.pipeline_mode<synchronous>, transform_indices = @transform_1, window_bounds = array<i64: 32, 256>}, {pipeline_mode = #tpu.pipeline_mode<synchronous>, transform_indices = @transform_2, window_bounds = array<i64: 1, 256>}, {pipeline_mode = #tpu.pipeline_mode<synchronous>, transform_indices = @transform_3, window_bounds = array<i64: 256, 512>}, {pipeline_mode = #tpu.pipeline_mode<synchronous>, transform_indices = @transform_4, window_bounds = array<i64: 1, 512>}, {pipeline_mode = #tpu.pipeline_mode<synchronous>, transform_indices = @transform_5, window_bounds = array<i64: 512, 128>}, {pipeline_mode = #tpu.pipeline_mode<synchronous>, transform_indices = @transform_6, window_bounds = array<i64: 1, 128>}, {transform_indices = @transform_7, window_bounds = array<i64: 8, 128>}]} {
    %c0 = arith.constant 0 : index
    %c0_0 = arith.constant 0 : index
    %0 = vector.load %arg1[%c0, %c0_0] : memref<8x32xf32, #tpu.memory_space<vmem>>, vector<8x32xf32>
    %1 = arith.truncf %0 : vector<8x32xf32> to vector<8x32xbf16>
    %c0_1 = arith.constant 0 : index
    %c0_2 = arith.constant 0 : index
    %2 = vector.load %arg2[%c0_1, %c0_2] : memref<32x256xbf16, #tpu.memory_space<vmem>>, vector<32x256xbf16>
    %cst = arith.constant dense<0.000000e+00> : vector<8x256xf32>
    %3 = tpu.matmul %1, %2, %cst {dimension_numbers = #tpu.dot_dimension_numbers<[1], [0], [0], [1], [0, 0, 1, 1], [], []>} : vector<8x32xbf16>, vector<32x256xbf16>, vector<8x256xf32> -> vector<8x256xf32>
    %c0_3 = arith.constant 0 : index
    %c0_4 = arith.constant 0 : index
    %4 = vector.load %arg3[%c0_3, %c0_4] : memref<1x256xf32, #tpu.memory_space<vmem>>, vector<1x256xf32>
    %5 = vector.broadcast %4 : vector<1x256xf32> to vector<8x256xf32>
    %6 = arith.addf %3, %5 : vector<8x256xf32>
    %7 = arith.truncf %6 : vector<8x256xf32> to vector<8x256xbf16>
    %8 = math.tanh %7 : vector<8x256xbf16>
    %c0_5 = arith.constant 0 : index
    %c0_6 = arith.constant 0 : index
    %9 = vector.load %arg4[%c0_5, %c0_6] : memref<256x512xbf16, #tpu.memory_space<vmem>>, vector<256x512xbf16>
    %cst_7 = arith.constant dense<0.000000e+00> : vector<8x512xf32>
    %10 = tpu.matmul %8, %9, %cst_7 {dimension_numbers = #tpu.dot_dimension_numbers<[1], [0], [0], [1], [0, 0, 1, 1], [], []>} : vector<8x256xbf16>, vector<256x512xbf16>, vector<8x512xf32> -> vector<8x512xf32>
    %c0_8 = arith.constant 0 : index
    %c0_9 = arith.constant 0 : index
    %11 = vector.load %arg5[%c0_8, %c0_9] : memref<1x512xf32, #tpu.memory_space<vmem>>, vector<1x512xf32>
    %12 = vector.broadcast %11 : vector<1x512xf32> to vector<8x512xf32>
    %13 = arith.addf %10, %12 : vector<8x512xf32>
    %14 = arith.truncf %13 : vector<8x512xf32> to vector<8x512xbf16>
    %15 = math.tanh %14 : vector<8x512xbf16>
    %c0_10 = arith.constant 0 : index
    %c0_11 = arith.constant 0 : index
    %16 = vector.load %arg6[%c0_10, %c0_11] : memref<512x128xbf16, #tpu.memory_space<vmem>>, vector<512x128xbf16>
    %cst_12 = arith.constant dense<0.000000e+00> : vector<8x128xf32>
    %17 = tpu.matmul %15, %16, %cst_12 {dimension_numbers = #tpu.dot_dimension_numbers<[1], [0], [0], [1], [0, 0, 1, 1], [], []>} : vector<8x512xbf16>, vector<512x128xbf16>, vector<8x128xf32> -> vector<8x128xf32>
    %c0_13 = arith.constant 0 : index
    %c0_14 = arith.constant 0 : index
    %18 = vector.load %arg7[%c0_13, %c0_14] : memref<1x128xf32, #tpu.memory_space<vmem>>, vector<1x128xf32>
    %19 = vector.broadcast %18 : vector<1x128xf32> to vector<8x128xf32>
    %20 = arith.addf %17, %19 : vector<8x128xf32>
    %21 = math.tanh %20 : vector<8x128xf32>
    %c0_15 = arith.constant 0 : index
    %c0_16 = arith.constant 0 : index
    %22 = vector.load %arg8[%c0_15, %c0_16] : memref<8x128xf32, #tpu.memory_space<vmem>>, vector<8x128xf32>
    tpu.vector_store %arg8[%c0_15, %c0_16], %21 {strides = array<i32>} : memref<8x128xf32, #tpu.memory_space<vmem>>, vector<8x128xf32>,
    return
  }
  func.func @transform_0(%arg0: i32) -> (i32, i32) {
    %c0_i32 = arith.constant 0 : i32
    %c0_i32_0 = arith.constant 0 : i32
    return %arg0, %c0_i32 : i32, i32
  }
  func.func @transform_1(%arg0: i32) -> (i32, i32) {
    %c0_i32 = arith.constant 0 : i32
    %c0_i32_0 = arith.constant 0 : i32
    %c0_i32_1 = arith.constant 0 : i32
    return %c0_i32, %c0_i32_0 : i32, i32
  }
  func.func @transform_2(%arg0: i32) -> (i32, i32) {
    %c0_i32 = arith.constant 0 : i32
    %c0_i32_0 = arith.constant 0 : i32
    %c0_i32_1 = arith.constant 0 : i32
    return %c0_i32, %c0_i32_0 : i32, i32
  }
  func.func @transform_3(%arg0: i32) -> (i32, i32) {
    %c0_i32 = arith.constant 0 : i32
    %c0_i32_0 = arith.constant 0 : i32
    %c0_i32_1 = arith.constant 0 : i32
    return %c0_i32, %c0_i32_0 : i32, i32
  }
  func.func @transform_4(%arg0: i32) -> (i32, i32) {
    %c0_i32 = arith.constant 0 : i32
    %c0_i32_0 = arith.constant 0 : i32
    %c0_i32_1 = arith.constant 0 : i32
    return %c0_i32, %c0_i32_0 : i32, i32
  }
  func.func @transform_5(%arg0: i32) -> (i32, i32) {
    %c0_i32 = arith.constant 0 : i32
    %c0_i32_0 = arith.constant 0 : i32
    %c0_i32_1 = arith.constant 0 : i32
    return %c0_i32, %c0_i32_0 : i32, i32
  }
  func.func @transform_6(%arg0: i32) -> (i32, i32) {
    %c0_i32 = arith.constant 0 : i32
    %c0_i32_0 = arith.constant 0 : i32
    %c0_i32_1 = arith.constant 0 : i32
    return %c0_i32, %c0_i32_0 : i32, i32
  }
  func.func @transform_7(%arg0: i32) -> (i32, i32) {
    %c0_i32 = arith.constant 0 : i32
    %c0_i32_0 = arith.constant 0 : i32
    return %arg0, %c0_i32 : i32, i32
  }
}

</mosaic_0001>

<bundles_post_ra>
// kernel: tpu_custom_call.1
= control target key start
LH: loop header
LB: loop body
LE: loop exit
PB: predicated region body
PF: predicated region fallthrough
CT: control target
= control target key end

     0   :  { %12 = vsyncpa [#allocation3], 0  ;;  %s1530_s0 = inlined_call_operand.hbm [shape: f32[8,32], index: 0, kind: input, shape index: {}]   ;;  %s1531_s1 = inlined_call_operand.hbm [shape: bf16[32,256], index: 1, kind: input, shape index: {}]   ;;  %s1532_s2 = inlined_call_operand.vmem [shape: f32[1,256], index: 2, kind: input, shape index: {}]   ;;  %s1533_s3 = inlined_call_operand.hbm [shape: bf16[256,512], index: 3, kind: input, shape index: {}]   ;;  %s1534_s4 = inlined_call_operand.vmem [shape: f32[1,512], index: 4, kind: input, shape index: {}]   ;;  %s1535_s5 = inlined_call_operand.hbm [shape: bf16[512,128], index: 5, kind: input, shape index: {}]   ;;  %s1536_s6 = inlined_call_operand.vmem [shape: f32[1,128], index: 6, kind: input, shape index: {}]   ;;  %s1537_s7 = inlined_call_operand.hbm [shape: f32[8,128], index: 7, kind: output, shape index: {}]  }
   0x1   :  { %13 = vsyncpa [#allocation6], 0 }
   0x2   :  { %14 = vsyncpa [#allocation9], 0 }
   0x3   :  { %15 = vsyncpa [#allocation4], 0  ;;  %s1440_s24 = smov [#allocation5]  }
   0x4   :  { %s31_s25 = sshll.u32 %s1440_s24, 4  ;;  %s32_s25 = int_to_ptr.vmem [resolvable:$true] %s31_s25 }
   0x5   :  { %s1340_s26 = scalar_lea.vmem %s32_s25, 512  ;;  %p1345_p1 = scmp.lt.s32.totalorder %s32_s25, %s32_s25 }
   0x6   :  { %p1341_p0 = scmp.ne.s32.totalorder %s32_s25, %s1340_s26  ;;  %p1346_p2 = scmp.lt.s32.totalorder %s1340_s26, %s1340_s26 }
   0x8   :  { %p1347_p3 = por %p1346_p2, %p1345_p1 }
   0xa   :  { %p1348_p4 = pnand %p1347_p3, %p1341_p0 }
   0xc   :  { %1351 = shalt.err (!%p1348_p4)
}
   0xd   :  { %s1441_s27 = smov 128   ;;  %s1442_s28 = smov 8  }
   0xe   :  { %37 = dma.hbm_to_vmem [thread:$0]  %s1531_s1, 512, %s32_s25, [#allocation6], %s1441_s27, %s1441_s27, %s1442_s28  }
   0xf   :  { %s1443_s8 = smov [#allocation2]   ;;  %s1444_s10 = smov [#allocation7]  }
  0x10   :  { %s22_s9 = sshll.u32 %s1443_s8, 4  ;;  %s45_s11 = sshll.u32 %s1444_s10, 4  ;;  %s23_s9 = int_to_ptr.vmem [resolvable:$true] %s22_s9  ;;  %s46_s11 = int_to_ptr.vmem [resolvable:$true] %s45_s11 }
  0x11   :  { %s1360_s12 = scalar_lea.vmem %s23_s9, 128  ;;  %p1365_p6 = scmp.lt.s32.totalorder %s23_s9, %s23_s9 }
  0x12   :  { %p1361_p5 = scmp.ne.s32.totalorder %s23_s9, %s1360_s12  ;;  %p1366_p7 = scmp.lt.s32.totalorder %s1360_s12, %s1360_s12 }
  0x14   :  { %p1367_p8 = por %p1366_p7, %p1365_p6 }
  0x16   :  { %p1368_p9 = pnand %p1367_p8, %p1361_p5 }
  0x18   :  { %1371 = shalt.err (!%p1368_p9)
}
  0x19   :  { %25 = dma.hbm_to_vmem [thread:$0]  %s1530_s0, 128, %s23_s9, [#allocation3]  }
  0x1a   :  { %s1380_s15 = scalar_lea.vmem %s46_s11, 8192  ;;  %p1385_p11 = scmp.lt.s32.totalorder %s46_s11, %s46_s11 }
  0x1b   :  { %p1381_p10 = scmp.ne.s32.totalorder %s46_s11, %s1380_s15  ;;  %p1386_p12 = scmp.lt.s32.totalorder %s1380_s15, %s1380_s15 }
  0x1d   :  { %p1387_p13 = por %p1386_p12, %p1385_p11 }
  0x1f   :  { %p1388_p0 = pnand %p1387_p13, %p1381_p10 }
  0x21   :  { %1391 = shalt.err (!%p1388_p0)
}
  0x22   :  { %s1445_s1 = smov 256   ;;  %s1446_s16 = smov 16  }
  0x23   :  { %51 = dma.hbm_to_vmem [thread:$0]  %s1533_s3, 8192, %s46_s11, [#allocation6], %s1445_s1, %s1445_s1, %s1446_s16  }
  0x24   :  { %s1447_s19 = smov [#allocation8]  }
  0x25   :  { %s59_s20 = sshll.u32 %s1447_s19, 4  ;;  %s60_s20 = int_to_ptr.vmem [resolvable:$true] %s59_s20 }
  0x26   :  { %s1400_s21 = scalar_lea.vmem %s60_s20, 4096  ;;  %p1405_p2 = scmp.lt.s32.totalorder %s60_s20, %s60_s20 }
  0x27   :  { %p1401_p1 = scmp.ne.s32.totalorder %s60_s20, %s1400_s21  ;;  %p1406_p3 = scmp.lt.s32.totalorder %s1400_s21, %s1400_s21 }
  0x29   :  { %p1407_p4 = por %p1406_p3, %p1405_p2 }
  0x2b   :  { %p1408_p5 = pnand %p1407_p4, %p1401_p1 }
  0x2d   :  { %1411 = shalt.err (!%p1408_p5)
}
  0x2e   :  { %s1448_s0 = smov 64   ;;  %s1449_s22 = smov 4  }
  0x2f   :  { %65 = dma.hbm_to_vmem [thread:$0]  %s1535_s5, 4096, %s60_s20, [#allocation9], %s1448_s0, %s1448_s0, %s1449_s22  }
  0x30   :  { %1432 = dma.done.wait [#allocation3], 128  }
  0x31   :  { %1433 = vsyncadd [#allocation3], 4294967168 }
  0x32   :  { %1434 = dma.done.wait [#allocation6], 8704  }
  0x33   :  { %1435 = vsyncadd [#allocation6], 4294958592 }
  0x34   :  { %1436 = dma.done.wait [#allocation9], 4096  }
  0x35   :  { %1437 = vsyncadd [#allocation9], 4294963200  ;;  %v1450_v0 = vmov 0   ;;  %v1184_v1 = vld [vmem:[#allocation5 + $0x14] ss:$8 sps:$4 sm:$0xff]   ;;  %vm119_vm0 = vcmask 261120  }
  0x36   :  { %155 = vmatprep.mubr.bf16.mxu0 %v1450_v0  ;;  %v1186_v2 = vld [vmem:[#allocation5 + $0x10] ss:$8 sps:$4 sm:$0xff]   ;;  %135 = vmatprep.subr.bf16.mxu0 %v1184_v1  ;;  %v1187_v3 = vld [vmem:[#allocation5 + $0x4] ss:$8 sps:$4 sm:$0xff]   ;;  %v1189_v4 = vld [vmem:[#allocation5] ss:$8 sps:$4 sm:$0xff]  }
  0x37   :  { %v81_v5 = vld [vmem:[#allocation2] sm:$0xff]  ;;  %136 = vmatpush1.bf16.msra.mxu0 %v1186_v2  ;;  %v1190_v6 = vld [vmem:[#allocation7 + $0xe4] ss:$16 sps:$4 sm:$0xff]   ;;  %v1195_v8 = vld [vmem:[#allocation7 + $0xe0] ss:$16 sps:$4 sm:$0xff]   ;;  %s1451_s27 = smov [#allocation10]  }
  0x38   :  { %137 = vmatprep.subr.bf16.mxu0 %v1187_v3  ;;  %574 = vmatprep.subr.bf16.mxu1 %v1190_v6  ;;  %v1194_v7 = vld [vmem:[#allocation7 + $0xec] ss:$16 sps:$4 sm:$0xff]   ;;  %v82_v9 = vpack.c.bf16 %v81_v5, %v81_v5  ;;  %v1196_v10 = vld [vmem:[#allocation7 + $0xc4] ss:$16 sps:$4 sm:$0xff]   ;;  %v1192_v11 = vld [vmem:[#allocation7 + $0xe8] ss:$16 sps:$4 sm:$0xff]  }
  0x39   :  { %575 = vmatpush1.bf16.msra.mxu1 %v1195_v8  ;;  %v1200_v12 = vld [vmem:[#allocation7 + $0xcc] ss:$16 sps:$4 sm:$0xff]   ;;  %v1201_v13 = vld [vmem:[#allocation7 + $0xc0] ss:$16 sps:$4 sm:$0xff]   ;;  %v1202_v14 = vld [vmem:[#allocation7 + $0xa4] ss:$16 sps:$4 sm:$0xff]  }
  0x3a   :  { %576 = vmatprep.subr.bf16.mxu1 %v1196_v10  ;;  %v1198_v15 = vld [vmem:[#allocation7 + $0xc8] ss:$16 sps:$4 sm:$0xff]   ;;  %v1206_v16 = vld [vmem:[#allocation7 + $0xac] ss:$16 sps:$4 sm:$0xff]   ;;  %v1207_v17 = vld [vmem:[#allocation7 + $0xa0] ss:$16 sps:$4 sm:$0xff]  }
  0x3b   :  { %138 = vmatpush1.bf16.msra.mxu0 %v1189_v4  ;;  %v1208_v18 = vld [vmem:[#allocation7 + $0x84] ss:$16 sps:$4 sm:$0xff]   ;;  %v1204_v19 = vld [vmem:[#allocation7 + $0xa8] ss:$16 sps:$4 sm:$0xff]   ;;  %v1212_v20 = vld [vmem:[#allocation7 + $0x8c] ss:$16 sps:$4 sm:$0xff]  }
  0x3c   :  { %615 = vmatprep.subr.bf16.mxu0 %v1194_v7  ;;  %v1213_v21 = vld [vmem:[#allocation7 + $0x80] ss:$16 sps:$4 sm:$0xff]   ;;  %v1214_v22 = vld [vmem:[#allocation7 + $0x64] ss:$16 sps:$4 sm:$0xff]   ;;  %v1210_v23 = vld [vmem:[#allocation7 + $0x88] ss:$16 sps:$4 sm:$0xff]  }
  0x3d   :  { %577 = vmatpush1.bf16.msra.mxu1 %v1201_v13  ;;  %v1218_v24 = vld [vmem:[#allocation7 + $0x6c] ss:$16 sps:$4 sm:$0xff]   ;;  %v1219_v25 = vld [vmem:[#allocation7 + $0x60] ss:$16 sps:$4 sm:$0xff]   ;;  %v1220_v26 = vld [vmem:[#allocation7 + $0x44] ss:$16 sps:$4 sm:$0xff]  }
  0x3e   :  { %1030 = vmatmul.mubr.msk.bf16.vlgmr.msra.gmra.mxu0 %vm119_vm0, %v82_v9  ;;  %578 = vmatprep.subr.bf16.mxu1 %v1202_v14  ;;  %v1216_v27 = vld [vmem:[#allocation7 + $0x68] ss:$16 sps:$4 sm:$0xff]   ;;  %v1224_v28 = vld [vmem:[#allocation7 + $0x4c] ss:$16 sps:$4 sm:$0xff]   ;;  %v1225_v29 = vld [vmem:[#allocation7 + $0x40] ss:$16 sps:$4 sm:$0xff]   ;;  %v89_v9 = vlaneseq }
  0x3f   :  { %616 = vmatpush1.bf16.msra.mxu0 %v1192_v11  ;;  %v1226_v30 = vld [vmem:[#allocation7 + $0x24] ss:$16 sps:$4 sm:$0xff]   ;;  %v1222_v31 = vld [vmem:[#allocation7 + $0x48] ss:$16 sps:$4 sm:$0xff]   ;;  %v1230_v32 = vld [vmem:[#allocation7 + $0x2c] ss:$16 sps:$4 sm:$0xff]  }
  0x40   :  { %617 = vmatprep.subr.bf16.mxu0 %v1200_v12  ;;  %v1231_v33 = vld [vmem:[#allocation7 + $0x20] ss:$16 sps:$4 sm:$0xff]   ;;  %v1232_v34 = vld [vmem:[#allocation7 + $0x4] ss:$16 sps:$4 sm:$0xff]   ;;  %v1228_v35 = vld [vmem:[#allocation7 + $0x28] ss:$16 sps:$4 sm:$0xff]  }
  0x41   :  { %579 = vmatpush1.bf16.msra.mxu1 %v1207_v17  ;;  %v1236_v36 = vld [vmem:[#allocation7 + $0xc] ss:$16 sps:$4 sm:$0xff]   ;;  %v1237_v37 = vld [vmem:[#allocation7] ss:$16 sps:$4 sm:$0xff]   ;;  %v1238_v38 = vld [vmem:[#allocation7 + $0x1e4] ss:$16 sps:$4 sm:$0xff]  }
  0x42   :  { %580 = vmatprep.subr.bf16.mxu1 %v1208_v18  ;;  %v1234_v39 = vld [vmem:[#allocation7 + $0x8] ss:$16 sps:$4 sm:$0xff]   ;;  %v1243_v40 = vld [vmem:[#allocation7 + $0x1e0] ss:$16 sps:$4 sm:$0xff]   ;;  %v1242_v41 = vld [vmem:[#allocation7 + $0x1ec] ss:$16 sps:$4 sm:$0xff]  }
  0x43   :  { %618 = vmatpush1.bf16.msra.mxu0 %v1198_v15  ;;  %v1244_v42 = vld [vmem:[#allocation7 + $0x1c4] ss:$16 sps:$4 sm:$0xff]   ;;  %v1240_v43 = vld [vmem:[#allocation7 + $0x1e8] ss:$16 sps:$4 sm:$0xff]   ;;  %v1249_v44 = vld [vmem:[#allocation7 + $0x1c0] ss:$16 sps:$4 sm:$0xff]  }
  0x44   :  { %619 = vmatprep.subr.bf16.mxu0 %v1206_v16  ;;  %v1248_v45 = vld [vmem:[#allocation7 + $0x1cc] ss:$16 sps:$4 sm:$0xff]   ;;  %v1250_v46 = vld [vmem:[#allocation7 + $0x1a4] ss:$16 sps:$4 sm:$0xff]   ;;  %v1246_v47 = vld [vmem:[#allocation7 + $0x1c8] ss:$16 sps:$4 sm:$0xff]  }
  0x45   :  { %581 = vmatpush1.bf16.msra.mxu1 %v1213_v21  ;;  %v1254_v48 = vld [vmem:[#allocation7 + $0x1ac] ss:$16 sps:$4 sm:$0xff]   ;;  %v1252_v49 = vld [vmem:[#allocation7 + $0x1a8] ss:$16 sps:$4 sm:$0xff]   ;;  %v1255_v50 = vld [vmem:[#allocation7 + $0x1a0] ss:$16 sps:$4 sm:$0xff]  }
  0x46   :  { %582 = vmatprep.subr.bf16.mxu1 %v1214_v22  ;;  %v1256_v51 = vld [vmem:[#allocation7 + $0x184] ss:$16 sps:$4 sm:$0xff]   ;;  %v1260_v52 = vld [vmem:[#allocation7 + $0x18c] ss:$16 sps:$4 sm:$0xff]   ;;  %v1258_v53 = vld [vmem:[#allocation7 + $0x188] ss:$16 sps:$4 sm:$0xff]  }
  0x47   :  { %620 = vmatpush1.bf16.msra.mxu0 %v1204_v19  ;;  %v1261_v54 = vld [vmem:[#allocation7 + $0x180] ss:$16 sps:$4 sm:$0xff]   ;;  %v1262_v55 = vld [vmem:[#allocation7 + $0x164] ss:$16 sps:$4 sm:$0xff]   ;;  %v1266_v56 = vld [vmem:[#allocation7 + $0x16c] ss:$16 sps:$4 sm:$0xff]  }
  0x48   :  { %621 = vmatprep.subr.bf16.mxu0 %v1212_v20  ;;  %v1264_v57 = vld [vmem:[#allocation7 + $0x168] ss:$16 sps:$4 sm:$0xff]   ;;  %v1267_v58 = vld [vmem:[#allocation7 + $0x160] ss:$16 sps:$4 sm:$0xff]   ;;  %v1268_v59 = vld [vmem:[#allocation7 + $0x144] ss:$16 sps:$4 sm:$0xff]  }
  0x49   :  { %583 = vmatpush1.bf16.msra.mxu1 %v1219_v25  ;;  %v1272_v60 = vld [vmem:[#allocation7 + $0x14c] ss:$16 sps:$4 sm:$0xff]   ;;  %v1270_v61 = vld [vmem:[#allocation7 + $0x148] ss:$16 sps:$4 sm:$0xff]   ;;  %v1273_v62 = vld [vmem:[#allocation7 + $0x140] ss:$16 sps:$4 sm:$0xff]  }
  0x4a   :  { %584 = vmatprep.subr.bf16.mxu1 %v1220_v26  ;;  %v1274_v63 = vld [vmem:[#allocation7 + $0x124] ss:$16 sps:$4 sm:$0xff]   ;;  %v1278_v0 = vld [vmem:[#allocation7 + $0x12c] ss:$16 sps:$4 sm:$0xff]   ;;  %v1276_v1 = vld [vmem:[#allocation7 + $0x128] ss:$16 sps:$4 sm:$0xff]  }
  0x4b   :  { %622 = vmatpush1.bf16.msra.mxu0 %v1210_v23  ;;  %v1279_v2 = vld [vmem:[#allocation7 + $0x120] ss:$16 sps:$4 sm:$0xff]   ;;  %v1280_v3 = vld [vmem:[#allocation7 + $0x104] ss:$16 sps:$4 sm:$0xff]   ;;  %v1284_v4 = vld [vmem:[#allocation7 + $0x10c] ss:$16 sps:$4 sm:$0xff]  }
  0x4c   :  { %623 = vmatprep.subr.bf16.mxu0 %v1218_v24  ;;  %v1282_v5 = vld [vmem:[#allocation7 + $0x108] ss:$16 sps:$4 sm:$0xff]   ;;  %v1285_v6 = vld [vmem:[#allocation7 + $0x100] ss:$16 sps:$4 sm:$0xff]   ;;  %v1504_v10 = vshrl.u32 %v89_v9, 7  ;;  %s1015_s28 = sshll.u32 %s1451_s27, 4  ;;  %s1016_s28 = int_to_ptr.vmem [resolvable:$true] %s1015_s28 }
  0x4d   :  { %585 = vmatpush1.bf16.msra.mxu1 %v1225_v29  ;;  %v1286_v7 = vld [vmem:[#allocation8 + $0x78] sm:$0xff]   ;;  %s1412_s29 = scalar_lea.vmem %s1016_s28, 128  ;;  %p1417_p7 = scmp.lt.s32.totalorder %s1016_s28, %s1016_s28 }
  0x4e   :  { %586 = vmatprep.subr.bf16.mxu1 %v1226_v30  ;;  %v1287_v8 = vld [vmem:[#allocation8 + $0xf8] sm:$0xff]   ;;  %v91_v11 = vsub.s32 0, %v1504_v10  ;;  %v95_v13 = vsub.s32 1, %v1504_v10  ;;  %v1292_v30 = vld [vmem:[#allocation8 + $0x30] sm:$0xff]   ;;  %p1413_p6 = scmp.ne.s32.totalorder %s1016_s28, %s1412_s29  ;;  %p1418_p8 = scmp.lt.s32.totalorder %s1412_s29, %s1412_s29 }
  0x4f   :  { %624 = vmatpush1.bf16.msra.mxu0 %v1216_v27  ;;  %v87_v12 = vld [vmem:[%s1532_s2] sm:$0x3]  ;;  %v1290_v27 = vld [vmem:[#allocation8 + $0x70] sm:$0xff]  }
  0x50   :  { %625 = vmatprep.subr.bf16.mxu0 %v1224_v28  ;;  %v92_v14 = vrot.slane %v87_v12, %v91_v11  ;;  %v96_v15 = vrot.slane %v87_v12, %v95_v13  ;;  %v1288_v24 = vld [vmem:[#allocation8 + $0x38] sm:$0xff]   ;;  %v1291_v28 = vld [vmem:[#allocation8 + $0xf0] sm:$0xff]   ;;  %p1419_p9 = por %p1418_p8, %p1417_p7 }
  0x51   :  { %587 = vmatpush1.bf16.msra.mxu1 %v1231_v33  ;;  %v1289_v25 = vld [vmem:[#allocation8 + $0xb8] sm:$0xff]   ;;  %v1295_v33 = vld [vmem:[#allocation8 + $0xe8] sm:$0xff]  }
  0x52   :  { %588 = vmatprep.subr.bf16.mxu1 %v1232_v34  ;;  %v1296_v34 = vld [vmem:[#allocation8 + $0x28] sm:$0xff]   ;;  %p1420_p10 = pnand %p1419_p9, %p1413_p6 }
  0x53   :  { %626 = vmatpush1.bf16.msra.mxu0 %v1222_v31  ;;  %v1293_v31 = vld [vmem:[#allocation8 + $0xb0] sm:$0xff]  }
  0x54   :  { %627 = vmatprep.subr.bf16.mxu0 %v1230_v32  ;;  %v1294_v32 = vld [vmem:[#allocation8 + $0x68] sm:$0xff]  }
  0x55   :  { %589 = vmatpush1.bf16.msra.mxu1 %v1237_v37  ;;  %v1299_v37 = vld [vmem:[#allocation8 + $0xe0] sm:$0xff]  }
  0x56   :  { %590 = vmatprep.subr.bf16.mxu1 %v1238_v38  ;;  %v1300_v38 = vld [vmem:[#allocation8 + $0x20] sm:$0xff]  }
  0x57   :  { %628 = vmatpush1.bf16.msra.mxu0 %v1228_v35  ;;  %v1297_v35 = vld [vmem:[#allocation8 + $0xa8] sm:$0xff]  }
  0x58   :  { %629 = vmatprep.subr.bf16.mxu0 %v1236_v36  ;;  %v1298_v36 = vld [vmem:[#allocation8 + $0x60] sm:$0xff]  }
  0x59   :  { %591 = vmatpush2.bf16.msra.mxu1 %v1243_v40  ;;  %v1302_v40 = vld [vmem:[#allocation8 + $0x58] sm:$0xff]  }
  0x5a   :  { %592 = vmatprep.subr.bf16.mxu1 %v1244_v42  ;;  %v1304_v42 = vld [vmem:[#allocation8 + $0x18] sm:$0xff]  }
  0x5b   :  { %630 = vmatpush1.bf16.msra.mxu0 %v1234_v39  ;;  %v1301_v39 = vld [vmem:[#allocation8 + $0xa0] sm:$0xff]  }
  0x5c   :  { %631 = vmatprep.subr.bf16.mxu0 %v1242_v41  ;;  %v1303_v41 = vld [vmem:[#allocation8 + $0xd8] sm:$0xff]  }
  0x5d   :  { %593 = vmatpush2.bf16.msra.mxu1 %v1249_v44  ;;  %v1306_v44 = vld [vmem:[#allocation8 + $0x50] sm:$0xff]  }
  0x5e   :  { %594 = vmatprep.subr.bf16.mxu1 %v1250_v46  ;;  %v1308_v46 = vld [vmem:[#allocation8 + $0x10] sm:$0xff]  }
  0x5f   :  { %632 = vmatpush2.bf16.msra.mxu0 %v1240_v43  ;;  %v1305_v43 = vld [vmem:[#allocation8 + $0x98] sm:$0xff]  }
  0x60   :  { %633 = vmatprep.subr.bf16.mxu0 %v1248_v45  ;;  %v1307_v45 = vld [vmem:[#allocation8 + $0xd0] sm:$0xff]  }
  0x61   :  { %595 = vmatpush2.bf16.msra.mxu1 %v1255_v50  ;;  %v1312_v50 = vld [vmem:[#allocation8 + $0x8] sm:$0xff]  }
  0x62   :  { %596 = vmatprep.subr.bf16.mxu1 %v1256_v51  ;;  %v1313_v51 = vld [vmem:[#allocation8 + $0x88] sm:$0xff]  }
  0x63   :  { %634 = vmatpush2.bf16.msra.mxu0 %v1246_v47  ;;  %v1309_v47 = vld [vmem:[#allocation8 + $0x90] sm:$0xff]  }
  0x64   :  { %635 = vmatprep.subr.bf16.mxu0 %v1254_v48  ;;  %v1310_v48 = vld [vmem:[#allocation8 + $0x48] sm:$0xff]  }
  0x65   :  { %597 = vmatpush2.bf16.msra.mxu1 %v1261_v54  ;;  %v1316_v54 = vld [vmem:[#allocation8] sm:$0xff]  }
  0x66   :  { %598 = vmatprep.subr.bf16.mxu1 %v1262_v55  ;;  %v1317_v55 = vld [vmem:[#allocation8 + $0x80] sm:$0xff]  }
  0x67   :  { %636 = vmatpush2.bf16.msra.mxu0 %v1252_v49  ;;  %v1311_v49 = vld [vmem:[#allocation8 + $0xc8] sm:$0xff]  }
  0x68   :  { %637 = vmatprep.subr.bf16.mxu0 %v1260_v52  ;;  %v1314_v52 = vld [vmem:[#allocation8 + $0x40] sm:$0xff]  }
  0x69   :  { %599 = vmatpush2.bf16.msra.mxu1 %v1267_v58  ;;  %v248_v58 = vsub.s32 3, %v1504_v10 }
  0x6a   :  { %600 = vmatprep.subr.bf16.mxu1 %v1268_v59 }
  0x6b   :  { %638 = vmatpush2.bf16.msra.mxu0 %v1258_v53  ;;  %v1315_v53 = vld [vmem:[#allocation8 + $0xc0] sm:$0xff]  }
  0x6c   :  { %639 = vmatprep.subr.bf16.mxu0 %v1266_v56  ;;  %v244_v56 = vsub.s32 2, %v1504_v10 }
  0x6d   :  { %601 = vmatpush2.bf16.msra.mxu1 %v1273_v62 }
  0x6e   :  { %602 = vmatprep.subr.bf16.mxu1 %v1274_v63 }
  0x6f   :  { %640 = vmatpush2.bf16.msra.mxu0 %v1264_v57  ;;  %v232_v57 = vld [vmem:[%s1534_s4] sm:$0xf] }
  0x70   :  { %641 = vmatprep.subr.bf16.mxu0 %v1272_v60  ;;  %v237_v59 = vrot.slane %v232_v57, %v91_v11  ;;  %v245_v60 = vrot.slane %v232_v57, %v244_v56  ;;  %v249_v62 = vrot.slane %v232_v57, %v248_v58 }
  0x71   :  { %603 = vmatpush2.bf16.msra.mxu1 %v1279_v2 }
  0x72   :  { %604 = vmatprep.subr.bf16.mxu1 %v1280_v3 }
  0x73   :  { %642 = vmatpush2.bf16.msra.mxu0 %v1270_v61  ;;  %v241_v61 = vrot.slane %v232_v57, %v95_v13 }
  0x74   :  { %643 = vmatprep.subr.bf16.mxu0 %v1278_v0 }
  0x75   :  { %605 = vmatpush2.bf16.msra.mxu1 %v1285_v6 }
  0x76   :  { %1128 = vmatprep.subr.bf16.mxu1 %v1286_v7 }
  0x77   :  { %644 = vmatpush2.bf16.msra.mxu0 %v1276_v1 }
  0x78   :  { %645 = vmatprep.subr.bf16.mxu0 %v1284_v4 }
  0x7b   :  { %646 = vmatpush2.bf16.msra.mxu0 %v1282_v5 }
  0x7c   :  { %1150 = vmatprep.subr.bf16.mxu0 %v1287_v8 }
  0xfe   :  { %v157_v16 = vpop.f32.mrf.mxu0 }
  0xff   :  { %v158_v17 = vadd.f32 %v157_v16, %v92_v14 }
 0x100   :  { %v159_v18 = vpop.f32.mrf.mxu0 }
 0x101   :  { %v160_v19 = vadd.f32 %v159_v18, %v96_v15  ;;  %v164_v20 = vpack.c.bf16 %v158_v17, %v158_v17 }
 0x102   :  { %v161_v21 = vpop.f32.mrf.mxu0 }
 0x103   :  { %v165_v22 = vpack.c.bf16 %v160_v19, %v160_v19  ;;  %v1095_v21 = vld [vmem:[%s1536_s6] ss:$0 sm:$0xff] }
 0x104   :  { %v162_v23 = vpop.f32.mrf.mxu0 }
 0x105   :  { %1318 = vtanh.bf16 %v165_v22 }
 0x106   :  { %1320 = vtanh.bf16 %v164_v20 }
 0x113   :  { %v1319_v26 = vpop.eup %1318 }
 0x114   :  { %v1321_v29 = vpop.eup %1320  ;;  %606 = vmatprep.mubr.bf16.mxu1 %v1319_v26  ;;  %647 = vmatprep.mubr.bf16.mxu0 %v1319_v26 }
 0x115   :  { %607 = vmatmul.mubr.bf16.vlgmr.msra.gmra.mxu1 %v1321_v29  ;;  %648 = vmatmul.mubr.bf16.vlgmr.msra.gmra.mxu0 %v1321_v29 }
 0x116   :  { %1129 = vmatpush3.bf16.msra.mxu1 %v1288_v24  ;;  %1151 = vmatpush3.bf16.msra.mxu0 %v1289_v25 }
 0x117   :  { %1130 = vmatprep.subr.bf16.mxu1 %v1290_v27  ;;  %1152 = vmatprep.subr.bf16.mxu0 %v1291_v28 }
 0x11a   :  { %1131 = vmatpush3.bf16.msra.mxu1 %v1292_v30  ;;  %1153 = vmatpush3.bf16.msra.mxu0 %v1293_v31 }
 0x11b   :  { %1132 = vmatprep.subr.bf16.mxu1 %v1294_v32  ;;  %1154 = vmatprep.subr.bf16.mxu0 %v1295_v33 }
 0x11e   :  { %1133 = vmatpush3.bf16.msra.mxu1 %v1296_v34  ;;  %1155 = vmatpush3.bf16.msra.mxu0 %v1297_v35 }
 0x11f   :  { %1134 = vmatprep.subr.bf16.mxu1 %v1298_v36  ;;  %1156 = vmatprep.subr.bf16.mxu0 %v1299_v37 }
 0x122   :  { %1135 = vmatpush3.bf16.msra.mxu1 %v1300_v38  ;;  %1157 = vmatpush3.bf16.msra.mxu0 %v1301_v39 }
 0x123   :  { %1136 = vmatprep.subr.bf16.mxu1 %v1302_v40  ;;  %1158 = vmatprep.subr.bf16.mxu0 %v1303_v41 }
 0x126   :  { %1137 = vmatpush3.bf16.msra.mxu1 %v1304_v42  ;;  %1159 = vmatpush3.bf16.msra.mxu0 %v1305_v43 }
 0x127   :  { %1138 = vmatprep.subr.bf16.mxu1 %v1306_v44  ;;  %1160 = vmatprep.subr.bf16.mxu0 %v1307_v45 }
 0x12a   :  { %1139 = vmatpush3.bf16.msra.mxu1 %v1308_v46  ;;  %1161 = vmatpush3.bf16.msra.mxu0 %v1309_v47 }
 0x12b   :  { %1140 = vmatprep.subr.bf16.mxu1 %v1310_v48  ;;  %1162 = vmatprep.subr.bf16.mxu0 %v1311_v49 }
 0x12e   :  { %1141 = vmatpush3.bf16.msra.mxu1 %v1312_v50  ;;  %1163 = vmatpush3.bf16.msra.mxu0 %v1313_v51 }
 0x12f   :  { %1142 = vmatprep.subr.bf16.mxu1 %v1314_v52  ;;  %1164 = vmatprep.subr.bf16.mxu0 %v1315_v53 }
 0x132   :  { %1143 = vmatpush3.bf16.msra.mxu1 %v1316_v54  ;;  %1165 = vmatpush3.bf16.msra.mxu0 %v1317_v55 }
 0x1d5   :  { %v608_v63 = vpop.f32.mrf.mxu1  ;;  %v649_v0 = vpop.f32.mrf.mxu0 }
 0x1d6   :  { %v609_v1 = vadd.f32 %v608_v63, %v237_v59  ;;  %v650_v2 = vadd.f32 %v649_v0, %v245_v60 }
 0x1d7   :  { %v610_v3 = vpop.f32.mrf.mxu1  ;;  %v651_v4 = vpop.f32.mrf.mxu0 }
 0x1d8   :  { %v656_v5 = vpack.c.bf16 %v609_v1, %v609_v1  ;;  %v611_v6 = vadd.f32 %v610_v3, %v241_v61  ;;  %v652_v7 = vadd.f32 %v651_v4, %v249_v62  ;;  %v658_v12 = vpack.c.bf16 %v650_v2, %v650_v2 }
 0x1d9   :  { %v612_v8 = vpop.f32.mrf.mxu1  ;;  %v653_v9 = vpop.f32.mrf.mxu0 }
 0x1da   :  { %v657_v14 = vpack.c.bf16 %v611_v6, %v611_v6  ;;  %v659_v15 = vpack.c.bf16 %v652_v7, %v652_v7  ;;  %1322 = vtanh.bf16 %v656_v5 }
 0x1db   :  { %v613_v11 = vpop.f32.mrf.mxu1  ;;  %v654_v16 = vpop.f32.mrf.mxu0 }
 0x1dc   :  { %1324 = vtanh.bf16 %v657_v14 }
 0x1dd   :  { %1326 = vtanh.bf16 %v659_v15 }
 0x1de   :  { %1328 = vtanh.bf16 %v658_v12 }
 0x1e8   :  { %v1323_v10 = vpop.eup %1322 }
 0x1ea   :  { %v1325_v13 = vpop.eup %1324 }
 0x1eb   :  { %v1327_v17 = vpop.eup %1326  ;;  %959 = vmatprep.mubr.bf16.mxu1 %v1325_v13 }
 0x1ec   :  { %v1329_v18 = vpop.eup %1328  ;;  %999 = vmatprep.mubr.bf16.mxu0 %v1327_v17  ;;  %960 = vmatmul.mubr.bf16.vlgmr.msra.gmra.mxu1 %v1323_v10 }
 0x1ed   :  { %1000 = vmatmul.mubr.bf16.vlgmr.msra.gmra.mxu0 %v1329_v18 }
 0x2ac   :  { %v1144_v19 = vpop.f32.mrf.mxu1 }
 0x2ad   :  { %v1166_v20 = vpop.f32.mrf.mxu0 }
 0x2ae   :  { %v1145_v22 = vpop.f32.mrf.mxu1 }
 0x2af   :  { %v1146_v23 = vadd.f32 %v1145_v22, %v1144_v19  ;;  %v1167_v24 = vpop.f32.mrf.mxu0 }
 0x2b0   :  { %v1147_v25 = vpop.f32.mrf.mxu1  ;;  %v1168_v27 = vadd.f32 %v1167_v24, %v1166_v20 }
 0x2b1   :  { %v962_v26 = vadd.f32 %v1146_v23, %v1095_v21  ;;  %v1169_v28 = vpop.f32.mrf.mxu0 }
 0x2b2   :  { %v1148_v29 = vpop.f32.mrf.mxu1 }
 0x2b3   :  { %v1002_v30 = vadd.f32 %v1168_v27, %v962_v26  ;;  %v1170_v31 = vpop.f32.mrf.mxu0 }
 0x2b5   :  { %1330 = vtanh.f32 %v1002_v30 }
 0x2c2   :  { %v1331_v32 = vpop.eup %1330 }
 0x2c3   :  { %1008 = vst [vmem:[#allocation10] sm:$0xff] %v1331_v32 }
 0x2c4   :  { %1423 = shalt.err (!%p1420_p10)
}
 0x2c5   :  { %1018 = dma.vmem_to_hbm [thread:$0]  %s1016_s28, 128, %s1537_s7, [#allocation4]  }
 0x2c6   :  { %1438 = dma.done.wait [#allocation4], 128  }
 0x2c7   :  { %1439 = vsyncadd [#allocation4], 4294967168 }
 0x2c8   :  { %1022 = vsyncpa [#allocation3], 1 }
 0x2c9   :  { %1023 = vsyncpa [#allocation6], 1 }
 0x2ca   :  { %1024 = vsyncpa [#allocation9], 1 }
 0x2cb   :  { %1025 = vsyncpa [#allocation4], 1 }

</bundles_post_ra>
